<compile_context>
chip_gen: v5e
topology: v5e:2x2
jax: 0.10.0
libtpu: 0.0.40
codegen_flags: <defaults>
</compile_context>

<pallas_src>
import jax
import jax.numpy as jnp
from jax.experimental import pallas as pl
from jax.experimental.pallas import tpu as pltpu

_LANES = 128
# Minimum sublane multiple per dtype width (bytes -> rows).
_SUBLANES = {4: 8, 2: 16, 1: 32}
# Below this many bytes, a fused XLA elementwise beats a kernel launch.
_MIN_PALLAS_BYTES = 256 * 1024
# Aim for at least this many grid steps so each TensorCore (megacore split)
# gets several pipelined steps.
_MIN_GRID_STEPS = 8


def _signed_sqrt_kernel(x_ref, o_ref):
    # x_ref / o_ref : (block_rows, 128) VMEM tiles.
    x = x_ref[...]
    s = jnp.sqrt(jnp.abs(x))                      # single EUP op per element
    o_ref[...] = jnp.where(x < 0, -s, s).astype(o_ref.dtype)


def _signed_sqrt_xla(x):
    # Fallback path (tiny inputs / unsupported dtypes): same math, fused by XLA.
    s = jnp.sqrt(jnp.abs(x))
    return jnp.where(x < 0, -s, s).astype(x.dtype)


def _choose_block_rows(rows, sublanes, target_block_rows):
    """Pick block_rows: multiple of `sublanes`, capped at target, >= _MIN_GRID_STEPS steps."""
    cap = max(sublanes, (target_block_rows // sublanes) * sublanes)
    if rows <= _MIN_GRID_STEPS * sublanes:
        # Too small to split usefully: one big block (single grid step).
        return min(rows, cap)
    by_steps = max(sublanes, (rows // _MIN_GRID_STEPS // sublanes) * sublanes)
    return min(cap, by_steps)


def signed_sqrt(x, *, target_block_rows=4096):
    """Elementwise signed sqrt: sqrt(relu(x)) - sqrt(relu(-x)). Any shape/float dtype."""
    orig_shape = x.shape
    dtype = x.dtype
    n = int(x.size)
    itemsize = jnp.dtype(dtype).itemsize

    # Small-input / unsupported-dtype fallback: no kernel launch.
    if (n == 0
            or not jnp.issubdtype(dtype, jnp.floating)
            or itemsize not in _SUBLANES
            or n * itemsize < _MIN_PALLAS_BYTES):
        return _signed_sqrt_xla(x)

    sublanes = _SUBLANES[itemsize]
    tile_elems = sublanes * _LANES

    # Lane-dense 2D slab.  Pad (and later slice) ONLY when n is not already a
    # multiple of the minimum (sublane, 128) tile -- padding materializes a full
    # HBM copy, which would otherwise double traffic on this mem-bound op.
    flat = jnp.ravel(x)
    if n % tile_elems == 0:
        rows = n // _LANES
        needs_slice = False
    else:
        rows = pl.cdiv(n, tile_elems) * sublanes
        flat = jnp.pad(flat, (0, rows * _LANES - n))   # zero tail -> harmless
        needs_slice = True
    x2d = flat.reshape(rows, _LANES)

    block_rows = _choose_block_rows(rows, sublanes, target_block_rows)
    grid = (pl.cdiv(rows, block_rows),)   # ragged last block handled by Pallas

    out2d = pl.pallas_call(
        _signed_sqrt_kernel,
        out_shape=jax.ShapeDtypeStruct((rows, _LANES), dtype),
        grid_spec=pltpu.PrefetchScalarGridSpec(
            num_scalar_prefetch=0,
            grid=grid,
            in_specs=[pl.BlockSpec((block_rows, _LANES), lambda i: (i, 0))],
            out_specs=pl.BlockSpec((block_rows, _LANES), lambda i: (i, 0)),
        ),
        compiler_params=pltpu.CompilerParams(
            dimension_semantics=("parallel",),
            vmem_limit_bytes=32 << 20,   # ~8 MiB actually used; headroom on v7x
        ),
    )(x2d)

    if needs_slice:
        return out2d.reshape(-1)[:n].reshape(orig_shape)
    return out2d.reshape(orig_shape)


if __name__ == "__main__":
    key = jax.random.PRNGKey(0)
    k0, k1, k2 = jax.random.split(key, 3)

    # (1) Module-consistent small 4D activation (exercises the fused-XLA fallback).
    x_small = jax.random.normal(k0, (2, 4, 16, 16), dtype=jnp.float32) * 3.0
    # (2) Larger, (8*128)-aligned element count -> Pallas path, no padding/slicing.
    x_big = jax.random.normal(k1, (8, 4, 64, 128), dtype=jnp.float32) * 3.0
    # (3) Unaligned element count -> Pallas path with minimal tail padding + ragged block.
    x_odd = jax.random.normal(k2, (2, 7, 129, 130), dtype=jnp.float32) * 3.0

    for xi in (x_small, x_big, x_odd):
        out = jax.block_until_ready(signed_sqrt(xi))
        ref = jnp.sqrt(jax.nn.relu(xi)) - jnp.sqrt(jax.nn.relu(-xi))
        assert out.shape == xi.shape and out.dtype == xi.dtype
        assert jnp.allclose(out, ref, atol=1e-6, rtol=1e-6)

    print("KERNEL_OK")
</pallas_src>

<mosaic_0001>
module attributes {stable_mosaic.version = 11 : i64} {
  func.func @_signed_sqrt_kernel(%arg0: i32, %arg1: memref<256x128xf32, #tpu.memory_space<vmem>>, %arg2: memref<256x128xf32, #tpu.memory_space<vmem>>) attributes {dimension_semantics = [#tpu.dimension_semantics<parallel>], iteration_bounds = array<i64: 8>, scalar_prefetch = 0 : i64, scratch_operands = 0 : i64, tpu.core_type = #tpu.core_type<tc>, window_params = [{transform_indices = @transform_0, window_bounds = array<i64: 256, 128>}, {transform_indices = @transform_1, window_bounds = array<i64: 256, 128>}]} {
    %c0 = arith.constant 0 : index
    %c0_0 = arith.constant 0 : index
    %0 = vector.load %arg1[%c0, %c0_0] : memref<256x128xf32, #tpu.memory_space<vmem>>, vector<256x128xf32>
    %1 = math.absf %0 : vector<256x128xf32>
    %2 = math.sqrt %1 : vector<256x128xf32>
    %cst = arith.constant 0.000000e+00 : f32
    %3 = vector.broadcast %cst : f32 to vector<256x128xf32>
    %4 = arith.cmpf olt, %0, %3 : vector<256x128xf32>
    %cst_1 = arith.constant 0.000000e+00 : f32
    %5 = vector.broadcast %cst_1 : f32 to vector<256x128xf32>
    %6 = arith.subf %5, %2 : vector<256x128xf32>
    %7 = arith.select %4, %6, %2 : vector<256x128xi1>, vector<256x128xf32>
    %c0_2 = arith.constant 0 : index
    %c0_3 = arith.constant 0 : index
    %8 = vector.load %arg2[%c0_2, %c0_3] : memref<256x128xf32, #tpu.memory_space<vmem>>, vector<256x128xf32>
    tpu.vector_store %arg2[%c0_2, %c0_3], %7 {strides = array<i32>} : memref<256x128xf32, #tpu.memory_space<vmem>>, vector<256x128xf32>,
    return
  }
  func.func @transform_0(%arg0: i32) -> (i32, i32) {
    %c0_i32 = arith.constant 0 : i32
    %c0_i32_0 = arith.constant 0 : i32
    return %arg0, %c0_i32 : i32, i32
  }
  func.func @transform_1(%arg0: i32) -> (i32, i32) {
    %c0_i32 = arith.constant 0 : i32
    %c0_i32_0 = arith.constant 0 : i32
    return %arg0, %c0_i32 : i32, i32
  }
}

</mosaic_0001>

<bundles_post_ra>
// kernel: tpu_custom_call.1
= control target key start
LH: loop header
LB: loop body
LE: loop exit
PB: predicated region body
PF: predicated region fallthrough
CT: control target
= control target key end

     0   :  { %6 = vsyncpa [#allocation3], 0  ;;  %s1809_s0 = inlined_call_operand.hbm [shape: f32[2048,128], index: 0, kind: input, shape index: {}]   ;;  %s1810_s1 = inlined_call_operand.hbm [shape: f32[2048,128], index: 1, kind: output, shape index: {}]  }
   0x1   :  { %8 = vsyncpa [#allocation3 + $0x1], 0 }
   0x2   :  { %9 = vsyncpa [#allocation4], 0 }
   0x3   :  { %11 = vsyncpa [#allocation4 + $0x1], 0  ;;  %s1046_s6 = smov 0   ;;  %s1048_s7 = smov 0  }
   0x4   :  { %s1050_s8 = smov 0   ;;  %s1052_s9 = smov 0  }
   0x5 LB: > { %s1067_s10 = sadd.s32 4294967295, %s1030_s9   ;;  %s804_s11 = sadd.s32 4294967294, %s1030_s9   ;;  %s1030_s9 = sphi %s1052_s9, %s1823_s9   ;;  %s1026_s8 = sphi %s1050_s8, %s1822_s8   ;;  %s1022_s7 = sphi %s1048_s7, %s1821_s7   ;;  %s1018_s6 = sphi %s1046_s6, %s1820_s6  }
   0x6   : > { %s1071_s12 = sadd.s32 1, %s1030_s9   ;;  %s24_s13 = sadd.s32 1, %s1026_s8 }
   0x7   : > { %s21_s14 = ssub.s32 %s1030_s9, %s1071_s12  ;;  %p31_p0 = scmp.ne.s32.totalorder %s1026_s8, %s1022_s7 }
   0x8   : > { %p22_p1 = scmp.eq.s32.totalorder %s21_s14, 0  ;;  %p32_p2 = scmp.eq.s32.totalorder %s1030_s9, 0 }
   0x9   : > { %p37_p3 = scmp.ne.s32.totalorder %s1022_s7, %s1018_s6  ;;  %p38_p4 = scmp.eq.s32.totalorder %s1067_s10, 0 }
   0xa   : > { %s1083_s15 = scalar_select %p22_p1, %s1026_s8, %s24_s13  }
   0xb   : > { %p1085_p5 = por %p32_p2, %p31_p0  ;;  %p1089_p6 = por %p38_p4, %p37_p3 }
   0xc   : > { %p61_p7 = scmp.eq.s32.totalorder %s1067_s10, 7  ;;  %p67_p8 = scmp.eq.s32.totalorder %s804_s11, 7 }
   0xd   : > { %p832_p9 = scmp.lt.s32.totalorder %s1030_s9, 8  ;;  %s87_s20 = sand.u32 1, %s1026_s8  }
   0xe   : > { %p1095_p10 = por %p61_p7, %p31_p0  ;;  %p1099_p11 = por %p67_p8, %p37_p3 }
   0xf   : > { %s818_s21 = sshll.u32 %s1030_s9, 8  ;;  %s807_s22 = sshll.u32 %s87_s20, 8 }
  0x10   : > { %s96_s25 = scalar_lea.hbm %s1809_s0, %s818_s21  ;;  %s91_s27 = scalar_lea.vmem [#allocation2], %s807_s22 }
  0x11   : > { %s97_s26 = sshll.u32 %s96_s25, 4  ;;  %s99_s28 = sshll.u32 %s91_s27, 4  ;;  %s98_s26 = int_to_ptr.hbm [resolvable:$true] %s97_s26  ;;  %s100_s28 = int_to_ptr.vmem [resolvable:$true] %s99_s28 }
  0x12   : > { %p1110_p12 = pnand %p832_p9, %p1085_p5  ;;  %p810_p13 = scmp.ge.s32.totalorder %s1030_s9, 1 }
  0x13   : > { %p107_p0 = scmp.lt.s32.totalorder %s1030_s9, 9  ;;  %s88_s30 = scalar_lea.sflag [#allocation3], %s87_s20 }
  0x14   : > { %s934_s2 = sshra.s32 %s98_s26, 4  ;;  %p938_p2 = pneg %p1110_p12  ;;  %s935_s2 = int_to_ptr.hbm [resolvable:$true] %s934_s2 }
  0x15   : > { %s936_s3 = scalar_lea.hbm %s935_s2, 256  ;;  %s941_s11 = scalar_lea.hbm %s1809_s0, 2048 }
  0x16   : > { %p937_p1 = scmp.ne.s32.totalorder %s935_s2, %s936_s3  ;;  %p942_p5 = scmp.lt.s32.totalorder %s935_s2, %s1809_s0 }
  0x17   : > { %p943_p7 = scmp.lt.s32.totalorder %s941_s11, %s936_s3 }
  0x18   : > { %p939_p3 = pnand %p938_p2, %p937_p1 }
  0x19   : > { %p944_p8 = por %p943_p7, %p942_p5 }
  0x1a   : > { %p940_p4 = pneg %p939_p3 }
  0x1c   : > { %p945_p9 = pnand %p944_p8, %p940_p4 }
  0x1e   : > { %948 = shalt.err (!%p945_p9)
}
  0x1f   : > { %s1032_s16 = smov 128   ;;  %s1033_s20 = smov 8  }
  0x20   : > { %827 = dma.hbm_to_vmem [thread:$0]  (!%p1110_p12), %s98_s26, 4096, %s100_s28, %s88_s30, %s1032_s16, %s1032_s16, %s1033_s20  }
  0x21   : > { %p108_p1 = pnand %p810_p13, %p107_p0 }
  0x22   : > { %s1131_s21 = sand.u32 (!%p108_p1), 1, %s1022_s7  }
  0x23   : > { %111 = sbr.rel (%p108_p1) target bundleno = 180 (0xb4), region = 24  ;;  %s811_s22 = sshll.u32 (!%p108_p1), %s1131_s21, 8 }
  0x24   : > { %s114_s23 = scalar_lea.sflag (!%p108_p1), [#allocation3], %s1131_s21  ;;  %s1137_s24 = scalar_lea.vmem (!%p108_p1), [#allocation2], %s811_s22 }
  0x28   : > { %1009 = dma.done.wait (%p1089_p6), %s114_s23, 4096  }
  0x29   : > { %1011 = vsyncadd (%p1089_p6), %s114_s23, 4294963200  ;;  %v1144_v0 = vld [vmem:[%s1137_s24] sm:$0xff]  ;;  %v1147_v1 = vld [vmem:[%s1137_s24 + $0x8] sm:$0xff]  ;;  %s1280_s17 = scalar_lea.vmem [#allocation5], %s811_s22  ;;  %s819_s25 = sshll.u32 %s1067_s10, 8 }
  0x2a   : > { %v1150_v2 = vld [vmem:[%s1137_s24 + $0x10] sm:$0xff]  ;;  %v1153_v3 = vand.u32 2147483647, %v1144_v0  ;;  %v1156_v4 = vand.u32 2147483647, %v1147_v1  ;;  %v1163_v6 = vld [vmem:[%s1137_s24 + $0x18] sm:$0xff]  ;;  %s727_s27 = scalar_lea.hbm %s1810_s1, %s819_s25 }
  0x2b   : > { %v1159_v5 = vand.u32 2147483647, %v1150_v2  ;;  %v1166_v7 = vld [vmem:[%s1137_s24 + $0x20] sm:$0xff]  ;;  %v1170_v8 = vld [vmem:[%s1137_s24 + $0x28] sm:$0xff]  ;;  %v1173_v9 = vld [vmem:[%s1137_s24 + $0x30] sm:$0xff]  ;;  %vm587_vm6 = vcmp.lt.f32.partialorder %v1144_v0, 0.0 }
  0x2c   : > { %870 = vrsqrt.f32 %v1153_v3  ;;  %v1177_v10 = vand.u32 2147483647, %v1163_v6  ;;  %v1180_v11 = vand.u32 2147483647, %v1166_v7  ;;  %v1183_v12 = vand.u32 2147483647, %v1170_v8 }
  0x2d   : > { %872 = vrsqrt.f32 %v1156_v4  ;;  %v1186_v13 = vand.u32 2147483647, %v1173_v9  ;;  %v1193_v17 = vld [vmem:[%s1137_s24 + $0x38] sm:$0xff]  ;;  %vm210_vm0 = vcmp.eq.f32.partialorder %v1153_v3, inf  ;;  %v213_v19 = vand.u32 2147483648, %v1153_v3  ;;  %v1210_v27 = vld [vmem:[%s1137_s24 + $0x40] sm:$0xff] }
  0x2e   : > { %874 = vrsqrt.f32 %v1159_v5  ;;  %vm212_vm1 = vcmp.eq.f32.partialorder %v1153_v3, 0.0  ;;  %vm222_vm2 = vcmp.eq.f32.partialorder %v1156_v4, inf  ;;  %v225_v22 = vand.u32 2147483648, %v1156_v4  ;;  %v1226_v43 = vld [vmem:[%s1137_s24 + $0x48] sm:$0xff]  ;;  %s728_s28 = sshll.u32 %s1280_s17, 4  ;;  %s730_s29 = sshll.u32 %s727_s27, 4  ;;  %s729_s28 = int_to_ptr.vmem [resolvable:$true] %s728_s28  ;;  %s731_s29 = int_to_ptr.hbm [resolvable:$true] %s730_s29 }
  0x2f   : > { %876 = vrsqrt.f32 %v1177_v10  ;;  %vm224_vm3 = vcmp.eq.f32.partialorder %v1156_v4, 0.0  ;;  %vm234_vm4 = vcmp.eq.f32.partialorder %v1159_v5, inf  ;;  %v237_v25 = vand.u32 2147483648, %v1159_v5  ;;  %s716_s30 = scalar_lea.sflag [#allocation4], %s1131_s21  ;;  %s978_s2 = sshra.s32 %s731_s29, 4  ;;  %s979_s2 = int_to_ptr.hbm [resolvable:$true] %s978_s2 }
  0x30   : > { %878 = vrsqrt.f32 %v1180_v11  ;;  %v1207_v26 = vand.u32 2147483647, %v1193_v17  ;;  %vm236_vm5 = vcmp.eq.f32.partialorder %v1159_v5, 0.0  ;;  %v249_v31 = vand.u32 2147483648, %v1177_v10  ;;  %s980_s3 = scalar_lea.hbm %s979_s2, 256  ;;  %s984_s11 = scalar_lea.hbm %s1810_s1, 2048 }
  0x31   : > { %880 = vrsqrt.f32 %v1183_v12  ;;  %v261_v32 = vand.u32 2147483648, %v1180_v11  ;;  %v273_v36 = vand.u32 2147483648, %v1183_v12  ;;  %v285_v37 = vand.u32 2147483648, %v1186_v13  ;;  %p981_p6 = scmp.ne.s32.totalorder %s979_s2, %s980_s3  ;;  %p985_p0 = scmp.lt.s32.totalorder %s979_s2, %s1810_s1 }
  0x32   : > { %v871_v14 = vpop.eup %870  ;;  %882 = vrsqrt.f32 %v1186_v13  ;;  %vm588_vm7 = vcmp.lt.f32.partialorder %v1147_v1, 0.0  ;;  %vm246_vm8 = vcmp.eq.f32.partialorder %v1177_v10, inf  ;;  %v1223_v42 = vand.u32 2147483647, %v1210_v27  ;;  %p986_p2 = scmp.lt.s32.totalorder %s984_s11, %s980_s3 }
  0x33   : > { %v873_v15 = vpop.eup %872  ;;  %v204_v16 = vmul.f32 %v871_v14, %v1153_v3  ;;  %vm589_vm9 = vcmp.lt.f32.partialorder %v1150_v2, 0.0  ;;  %vm248_vm10 = vcmp.eq.f32.partialorder %v1177_v10, 0.0  ;;  %vm258_vm11 = vcmp.eq.f32.partialorder %v1180_v11, inf  ;;  %p982_p12 = pnand %p981_p6, %p1095_p10 }
  0x34   : > { %v875_v18 = vpop.eup %874  ;;  %v216_v20 = vmul.f32 %v873_v15, %v1156_v4  ;;  %884 = vrsqrt.f32 %v1207_v26  ;;  %v1241_v55 = vand.u32 2147483647, %v1226_v43  ;;  %vm591_vm13 = vcmp.lt.f32.partialorder %v1166_v7, 0.0  ;;  %p987_p3 = por %p986_p2, %p985_p0 }
  0x35   : > { %v205_v21 = vmul.f32 %v871_v14, %v204_v16  ;;  %v228_v23 = vmul.f32 %v875_v18, %v1159_v5  ;;  %v877_v28 = vpop.eup %876  ;;  %vm282_vm12 = vcmp.eq.f32.partialorder %v1186_v13, inf  ;;  %886 = vrsqrt.f32 %v1223_v42  ;;  %p983_p13 = pneg %p982_p12 }
  0x36   : > { %v217_v24 = vmul.f32 %v873_v15, %v216_v20  ;;  %v879_v33 = vpop.eup %878  ;;  %v240_v35 = vmul.f32 %v877_v28, %v1177_v10  ;;  %vm592_vm15 = vcmp.lt.f32.partialorder %v1170_v8, 0.0  ;;  %vm284_vm14 = vcmp.eq.f32.partialorder %v1186_v13, 0.0 }
  0x37   : > { %v206_v29 = vmul.f32 0.5, %v205_v21  ;;  %v229_v30 = vmul.f32 %v875_v18, %v228_v23  ;;  %v881_v38 = vpop.eup %880  ;;  %v252_v41 = vmul.f32 %v879_v33, %v1180_v11  ;;  %888 = vrsqrt.f32 %v1241_v55  ;;  %p988_p4 = pnand %p987_p3, %p983_p13 }
  0x38   : > { %v218_v34 = vmul.f32 0.5, %v217_v24  ;;  %v1228_v44 = vpop.eup %882  ;;  %v241_v46 = vmul.f32 %v877_v28, %v240_v35  ;;  %v264_v47 = vmul.f32 %v881_v38, %v1183_v12 }
  0x39   : > { %v207_v39 = vsub.f32 1.5, %v206_v29  ;;  %v230_v40 = vmul.f32 0.5, %v229_v30  ;;  %v253_v50 = vmul.f32 %v879_v33, %v252_v41  ;;  %v276_v51 = vmul.f32 %v1228_v44, %v1186_v13 }
  0x3a   : > { %v219_v45 = vsub.f32 1.5, %v218_v34  ;;  %v242_v53 = vmul.f32 0.5, %v241_v46  ;;  %v265_v54 = vmul.f32 %v881_v38, %v264_v47 }
  0x3b   : > { %v208_v48 = vmul.f32 %v871_v14, %v207_v39  ;;  %v231_v49 = vsub.f32 1.5, %v230_v40  ;;  %v254_v58 = vmul.f32 0.5, %v253_v50  ;;  %v277_v59 = vmul.f32 %v1228_v44, %v276_v51 }
  0x3c   : > { %v220_v52 = vmul.f32 %v873_v15, %v219_v45  ;;  %v243_v61 = vsub.f32 1.5, %v242_v53  ;;  %v266_v62 = vmul.f32 0.5, %v265_v54  ;;  %v1325_v54 = vld [vmem:[%s1137_s24 + $0x50] sm:$0xff] }
  0x3d   : > { %v209_v56 = vmul.f32 %v208_v48, %v1153_v3  ;;  %v232_v57 = vmul.f32 %v875_v18, %v231_v49  ;;  %v255_v15 = vsub.f32 1.5, %v254_v58  ;;  %v278_v16 = vmul.f32 0.5, %v277_v59  ;;  %v885_v18 = vpop.eup %884 }
  0x3e   : > { %v221_v60 = vmul.f32 %v220_v52, %v1156_v4  ;;  %v244_v23 = vmul.f32 %v877_v28, %v243_v61  ;;  %v267_v24 = vsub.f32 1.5, %v266_v62  ;;  %v887_v45 = vpop.eup %886  ;;  %v1341_v8 = vand.u32 2147483647, %v1325_v54 }
  0x3f   : > { %v211_v63 = vsel %vm210_vm0, %v1153_v3, %v209_v56  ;;  %v233_v14 = vmul.f32 %v232_v57, %v1159_v5  ;;  %v256_v35 = vmul.f32 %v879_v33, %v255_v15  ;;  %v288_v33 = vmul.f32 %v885_v18, %v1207_v26  ;;  %v1336_v57 = vld [vmem:[%s1137_s24 + $0x58] sm:$0xff]  ;;  %v1357_v15 = vld [vmem:[%s1137_s24 + $0x68] sm:$0xff] }
  0x40   : > { %v214_v20 = vsel %vm212_vm1, %v213_v19, %v211_v63  ;;  %v223_v21 = vsel %vm222_vm2, %v1156_v4, %v221_v60  ;;  %v245_v28 = vmul.f32 %v244_v23, %v1177_v10  ;;  %v268_v39 = vmul.f32 %v881_v38, %v267_v24  ;;  %v1352_v63 = vld [vmem:[%s1137_s24 + $0x60] sm:$0xff] }
  0x41   : > { %v619_v29 = vsub.f32 0.0, %v214_v20  ;;  %v226_v30 = vsel %vm224_vm3, %v225_v22, %v223_v21  ;;  %v235_v34 = vsel %vm234_vm4, %v1159_v5, %v233_v14  ;;  %v257_v4 = vmul.f32 %v256_v35, %v1180_v11 }
  0x42   : > { %v620_v3 = vsub.f32 0.0, %v226_v30  ;;  %v238_v19 = vsel %vm236_vm5, %v237_v25, %v235_v34  ;;  %v279_v22 = vsub.f32 1.5, %v278_v16  ;;  %v247_v0 = vsel %vm246_vm8, %v1177_v10, %v245_v28  ;;  %v889_v16 = vpop.eup %888 }
  0x43   : > { %v651_v40 = vsel %vm587_vm6, %v619_v29, %v214_v20  ;;  %v621_v41 = vsub.f32 0.0, %v238_v19  ;;  %v269_v25 = vmul.f32 %v268_v39, %v1183_v12  ;;  %v250_v46 = vsel %vm248_vm10, %v249_v31, %v247_v0  ;;  %v1381_v39 = vld [vmem:[%s1137_s24 + $0x70] sm:$0xff] }
  0x44   : > { %683 = vst [vmem:[%s1280_s17] sm:$0xff] %v651_v40  ;;  %v652_v5 = vsel %vm588_vm7, %v620_v3, %v226_v30  ;;  %v259_v1 = vsel %vm258_vm11, %v1180_v11, %v257_v4  ;;  %v280_v47 = vmul.f32 %v1228_v44, %v279_v22  ;;  %v622_v48 = vsub.f32 0.0, %v250_v46  ;;  %v1387_v22 = vld [vmem:[%s1137_s24 + $0x78] sm:$0xff] }
  0x45   : > { %684 = vst [vmem:[%s1280_s17 + $0x8] sm:$0xff] %v652_v5  ;;  %v653_v38 = vsel %vm589_vm9, %v621_v41, %v238_v19  ;;  %vm1816_vm0 = vcmp.eq.f32.partialorder %v1180_v11, 0.0  ;;  %vm1817_vm1 = vcmp.eq.f32.partialorder %v1183_v12, inf  ;;  %v289_v31 = vmul.f32 %v885_v18, %v288_v33 }
  0x46   : > { %685 = vst [vmem:[%s1280_s17 + $0x10] sm:$0xff] %v653_v38  ;;  %v262_v2 = vsel %vm1816_vm0, %v261_v32, %v259_v1  ;;  %v271_v10 = vsel %vm1817_vm1, %v1183_v12, %v269_v25  ;;  %vm1818_vm2 = vcmp.eq.f32.partialorder %v1183_v12, 0.0  ;;  %v281_v50 = vmul.f32 %v280_v47, %v1186_v13 }
  0x47   : > { %v623_v49 = vsub.f32 0.0, %v262_v2  ;;  %v274_v44 = vsel %vm1818_vm2, %v273_v36, %v271_v10  ;;  %v300_v51 = vmul.f32 %v887_v45, %v1223_v42  ;;  %vm1819_vm3 = vcmp.lt.f32.partialorder %v1163_v6, 0.0 }
  0x48   : > { %v654_v11 = vsel %vm1819_vm3, %v622_v48, %v250_v46  ;;  %v624_v32 = vsub.f32 0.0, %v274_v44  ;;  %v290_v52 = vmul.f32 0.5, %v289_v31  ;;  %v283_v12 = vsel %vm282_vm12, %v1186_v13, %v281_v50 }
  0x49   : > { %686 = vst [vmem:[%s1280_s17 + $0x18] sm:$0xff] %v654_v11  ;;  %v655_v53 = vsel %vm591_vm13, %v623_v49, %v262_v2  ;;  %vm593_vm4 = vcmp.lt.f32.partialorder %v1173_v9, 0.0  ;;  %v301_v36 = vmul.f32 %v887_v45, %v300_v51  ;;  %v286_v7 = vsel %vm284_vm14, %v285_v37, %v283_v12  ;;  %v1411_v49 = vld [vmem:[%s1137_s24 + $0x80] sm:$0xff] }
  0x4a   : > { %687 = vst [vmem:[%s1280_s17 + $0x20] sm:$0xff] %v655_v53  ;;  %v656_v6 = vsel %vm592_vm15, %v624_v32, %v274_v44  ;;  %v291_v56 = vsub.f32 1.5, %v290_v52  ;;  %v625_v9 = vsub.f32 0.0, %v286_v7  ;;  %vm294_vm5 = vcmp.eq.f32.partialorder %v1207_v26, inf }
  0x4b   : > { %688 = vst [vmem:[%s1280_s17 + $0x28] sm:$0xff] %v656_v6  ;;  %v302_v58 = vmul.f32 0.5, %v301_v36  ;;  %v297_v13 = vand.u32 2147483648, %v1207_v26  ;;  %v1345_v61 = vand.u32 2147483647, %v1336_v57  ;;  %vm296_vm6 = vcmp.eq.f32.partialorder %v1207_v26, 0.0 }
  0x4c   : > { %v292_v59 = vmul.f32 %v885_v18, %v291_v56  ;;  %v657_v60 = vsel %vm593_vm4, %v625_v9, %v286_v7  ;;  %890 = vrsqrt.f32 %v1341_v8  ;;  %vm594_vm7 = vcmp.lt.f32.partialorder %v1193_v17, 0.0 }
  0x4d   : > { %v303_v37 = vsub.f32 1.5, %v302_v58  ;;  %689 = vst [vmem:[%s1280_s17 + $0x30] sm:$0xff] %v657_v60  ;;  %892 = vrsqrt.f32 %v1345_v61  ;;  %vm306_vm8 = vcmp.eq.f32.partialorder %v1223_v42, inf  ;;  %vm308_vm9 = vcmp.eq.f32.partialorder %v1223_v42, 0.0 }
  0x4e   : > { %v293_v62 = vmul.f32 %v292_v59, %v1207_v26  ;;  %v309_v20 = vand.u32 2147483648, %v1223_v42  ;;  %v312_v24 = vmul.f32 %v889_v16, %v1241_v55  ;;  %v1368_v29 = vand.u32 2147483647, %v1352_v63 }
  0x4f   : > { %v304_v14 = vmul.f32 %v887_v45, %v303_v37  ;;  %v1371_v34 = vand.u32 2147483647, %v1357_v15  ;;  %vm595_vm10 = vcmp.lt.f32.partialorder %v1210_v27, 0.0  ;;  %vm318_vm11 = vcmp.eq.f32.partialorder %v1241_v55, inf }
  0x50   : > { %v295_v18 = vsel %vm294_vm5, %v1207_v26, %v293_v62  ;;  %v313_v35 = vmul.f32 %v889_v16, %v312_v24  ;;  %894 = vrsqrt.f32 %v1368_v29  ;;  %vm320_vm12 = vcmp.eq.f32.partialorder %v1241_v55, 0.0 }
  0x51   : > { %v298_v21 = vsel %vm296_vm6, %v297_v13, %v295_v18  ;;  %v305_v23 = vmul.f32 %v304_v14, %v1223_v42  ;;  %896 = vrsqrt.f32 %v1371_v34  ;;  %v321_v17 = vand.u32 2147483648, %v1241_v55 }
  0x52   : > { %v626_v30 = vsub.f32 0.0, %v298_v21  ;;  %v891_v3 = vpop.eup %890  ;;  %v314_v41 = vmul.f32 0.5, %v313_v35  ;;  %vm596_vm13 = vcmp.lt.f32.partialorder %v1226_v43, 0.0  ;;  %vm330_vm14 = vcmp.eq.f32.partialorder %v1341_v8, inf }
  0x53   : > { %v307_v26 = vsel %vm306_vm8, %v1223_v42, %v305_v23  ;;  %v893_v40 = vpop.eup %892  ;;  %v324_v4 = vmul.f32 %v891_v3, %v1341_v8  ;;  %v1396_v33 = vand.u32 2147483647, %v1381_v39  ;;  %vm332_vm15 = vcmp.eq.f32.partialorder %v1341_v8, 0.0 }
  0x54   : > { %v658_v19 = vsel %vm594_vm7, %v626_v30, %v298_v21  ;;  %v310_v28 = vsel %vm308_vm9, %v309_v20, %v307_v26  ;;  %v336_v45 = vmul.f32 %v893_v40, %v1345_v61  ;;  %v315_v0 = vsub.f32 1.5, %v314_v41  ;;  %v1448_v30 = vld [vmem:[%s1137_s24 + $0x88] sm:$0xff] }
  0x55   : > { %690 = vst [vmem:[%s1280_s17 + $0x38] sm:$0xff] %v658_v19  ;;  %v627_v42 = vsub.f32 0.0, %v310_v28  ;;  %v325_v25 = vmul.f32 %v891_v3, %v324_v4  ;;  %v333_v38 = vand.u32 2147483648, %v1341_v8  ;;  %v1402_v1 = vand.u32 2147483647, %v1387_v22 }
  0x56   : > { %v337_v46 = vmul.f32 %v893_v40, %v336_v45  ;;  %v895_v47 = vpop.eup %894  ;;  %v316_v48 = vmul.f32 %v889_v16, %v315_v0  ;;  %vm342_vm0 = vcmp.eq.f32.partialorder %v1345_v61, inf  ;;  %898 = vrsqrt.f32 %v1396_v33 }
  0x57   : > { %v659_v5 = vsel %vm595_vm10, %v627_v42, %v310_v28  ;;  %v326_v2 = vmul.f32 0.5, %v325_v25  ;;  %vm597_vm1 = vcmp.lt.f32.partialorder %v1325_v54, 0.0  ;;  %vm344_vm2 = vcmp.eq.f32.partialorder %v1345_v61, 0.0  ;;  %v897_v44 = vpop.eup %896 }
  0x58   : > { %691 = vst [vmem:[%s1280_s17 + $0x40] sm:$0xff] %v659_v5  ;;  %v338_v27 = vmul.f32 0.5, %v337_v46  ;;  %v345_v10 = vand.u32 2147483648, %v1345_v61  ;;  %v348_v31 = vmul.f32 %v895_v47, %v1368_v29  ;;  %v317_v50 = vmul.f32 %v316_v48, %v1241_v55 }
  0x59   : > { %v327_v51 = vsub.f32 1.5, %v326_v2  ;;  %vm598_vm3 = vcmp.lt.f32.partialorder %v1336_v57, 0.0  ;;  %900 = vrsqrt.f32 %v1402_v1  ;;  %vm354_vm4 = vcmp.eq.f32.partialorder %v1368_v29, inf }
  0x5a   : > { %v339_v11 = vsub.f32 1.5, %v338_v27  ;;  %v349_v32 = vmul.f32 %v895_v47, %v348_v31  ;;  %v360_v52 = vmul.f32 %v897_v44, %v1371_v34  ;;  %v319_v53 = vsel %vm318_vm11, %v1241_v55, %v317_v50  ;;  %v1479_v27 = vld [vmem:[%s1137_s24 + $0x90] sm:$0xff] }
  0x5b   : > { %v328_v12 = vmul.f32 %v891_v3, %v327_v51  ;;  %vm356_vm5 = vcmp.eq.f32.partialorder %v1368_v29, 0.0  ;;  %v1423_v36 = vand.u32 2147483647, %v1411_v49  ;;  %v322_v6 = vsel %vm320_vm12, %v321_v17, %v319_v53 }
  0x5c   : > { %v340_v7 = vmul.f32 %v893_v40, %v339_v11  ;;  %v350_v56 = vmul.f32 0.5, %v349_v32  ;;  %v361_v9 = vmul.f32 %v897_v44, %v360_v52  ;;  %v899_v58 = vpop.eup %898  ;;  %v628_v59 = vsub.f32 0.0, %v322_v6 }
  0x5d   : > { %v329_v60 = vmul.f32 %v328_v12, %v1341_v8  ;;  %v357_v13 = vand.u32 2147483648, %v1368_v29  ;;  %vm599_vm6 = vcmp.lt.f32.partialorder %v1352_v63, 0.0  ;;  %902 = vrsqrt.f32 %v1423_v36 }
  0x5e   : > { %v341_v37 = vmul.f32 %v340_v7, %v1345_v61  ;;  %v351_v62 = vsub.f32 1.5, %v350_v56  ;;  %v362_v55 = vmul.f32 0.5, %v361_v9  ;;  %v372_v14 = vmul.f32 %v899_v58, %v1396_v33 }
  0x5f   : > { %v901_v16 = vpop.eup %900  ;;  %v660_v18 = vsel %vm596_vm13, %v628_v59, %v322_v6  ;;  %v331_v20 = vsel %vm330_vm14, %v1341_v8, %v329_v60  ;;  %vm366_vm7 = vcmp.eq.f32.partialorder %v1371_v34, inf  ;;  %vm368_vm8 = vcmp.eq.f32.partialorder %v1371_v34, 0.0 }
  0x60   : > { %vm600_vm9 = vcmp.lt.f32.partialorder %v1357_v15, 0.0  ;;  %692 = vst [vmem:[%s1280_s17 + $0x48] sm:$0xff] %v660_v18  ;;  %v334_v21 = vsel %vm332_vm15, %v333_v38, %v331_v20  ;;  %v343_v23 = vsel %vm342_vm0, %v1345_v61, %v341_v37  ;;  %v352_v43 = vmul.f32 %v895_v47, %v351_v62  ;;  %v1524_v18 = vld [vmem:[%s1137_s24 + $0xa8] sm:$0xff] }
  0x61   : > { %v363_v24 = vsub.f32 1.5, %v362_v55  ;;  %v629_v26 = vsub.f32 0.0, %v334_v21  ;;  %v346_v35 = vsel %vm344_vm2, %v345_v10, %v343_v23  ;;  %v373_v3 = vmul.f32 %v899_v58, %v372_v14  ;;  %v1519_v55 = vld [vmem:[%s1137_s24 + $0xa0] sm:$0xff] }
  0x62   : > { %v384_v19 = vmul.f32 %v901_v16, %v1402_v1  ;;  %v630_v28 = vsub.f32 0.0, %v346_v35  ;;  %v353_v8 = vmul.f32 %v352_v43, %v1368_v29  ;;  %v369_v42 = vand.u32 2147483648, %v1371_v34 }
  0x63   : > { %v364_v40 = vmul.f32 %v897_v44, %v363_v24  ;;  %v903_v41 = vpop.eup %902  ;;  %v661_v4 = vsel %vm597_vm1, %v629_v26, %v334_v21  ;;  %v374_v17 = vmul.f32 0.5, %v373_v3  ;;  %v1458_v5 = vand.u32 2147483647, %v1448_v30  ;;  %v1485_v44 = vld [vmem:[%s1137_s24 + $0x98] sm:$0xff] }
  0x64   : > { %v385_v45 = vmul.f32 %v901_v16, %v384_v19  ;;  %693 = vst [vmem:[%s1280_s17 + $0x50] sm:$0xff] %v661_v4  ;;  %v662_v61 = vsel %vm598_vm3, %v630_v28, %v346_v35  ;;  %v355_v0 = vsel %vm354_vm4, %v1368_v29, %v353_v8  ;;  %vm601_vm10 = vcmp.lt.f32.partialorder %v1381_v39, 0.0 }
  0x65   : > { %v365_v25 = vmul.f32 %v364_v40, %v1371_v34  ;;  %v396_v54 = vmul.f32 %v903_v41, %v1423_v36  ;;  %694 = vst [vmem:[%s1280_s17 + $0x58] sm:$0xff] %v662_v61  ;;  %v358_v38 = vsel %vm356_vm5, %v357_v13, %v355_v0  ;;  %v375_v46 = vsub.f32 1.5, %v374_v17 }
  0x66   : > { %v386_v47 = vmul.f32 0.5, %v385_v45  ;;  %904 = vrsqrt.f32 %v1458_v5  ;;  %v631_v57 = vsub.f32 0.0, %v358_v38  ;;  %vm378_vm11 = vcmp.eq.f32.partialorder %v1396_v33, inf }
  0x67   : > { %v367_v48 = vsel %vm366_vm7, %v1371_v34, %v365_v25  ;;  %vm602_vm12 = vcmp.lt.f32.partialorder %v1387_v22, 0.0  ;;  %v397_v2 = vmul.f32 %v903_v41, %v396_v54  ;;  %v376_v10 = vmul.f32 %v899_v58, %v375_v46  ;;  %v1545_v22 = vld [vmem:[%s1137_s24 + $0xb0] sm:$0xff]  ;;  %v1561_v25 = vld [vmem:[%s1137_s24 + $0xc0] sm:$0xff] }
  0x68   : > { %v370_v29 = vsel %vm368_vm8, %v369_v42, %v367_v48  ;;  %vm380_vm13 = vcmp.eq.f32.partialorder %v1396_v33, 0.0  ;;  %v387_v31 = vsub.f32 1.5, %v386_v47  ;;  %v663_v50 = vsel %vm599_vm6, %v631_v57, %v358_v38 }
  0x69   : > { %v632_v51 = vsub.f32 0.0, %v370_v29  ;;  %v381_v11 = vand.u32 2147483648, %v1396_v33  ;;  %v398_v32 = vmul.f32 0.5, %v397_v2  ;;  %695 = vst [vmem:[%s1280_s17 + $0x60] sm:$0xff] %v663_v50  ;;  %v377_v52 = vmul.f32 %v376_v10, %v1396_v33 }
  0x6a   : > { %v388_v53 = vmul.f32 %v901_v16, %v387_v31  ;;  %vm390_vm14 = vcmp.eq.f32.partialorder %v1402_v1, inf  ;;  %v1494_v34 = vand.u32 2147483647, %v1479_v27  ;;  %v393_v6 = vand.u32 2147483648, %v1402_v1 }
  0x6b   : > { %v664_v12 = vsel %vm600_vm9, %v632_v51, %v370_v29  ;;  %v399_v63 = vsub.f32 1.5, %v398_v32  ;;  %v1500_v7 = vand.u32 2147483647, %v1485_v44  ;;  %v379_v9 = vsel %vm378_vm11, %v1396_v33, %v377_v52 }
  0x6c   : > { %v905_v56 = vpop.eup %904  ;;  %696 = vst [vmem:[%s1280_s17 + $0x68] sm:$0xff] %v664_v12  ;;  %v389_v58 = vmul.f32 %v388_v53, %v1402_v1  ;;  %vm392_vm15 = vcmp.eq.f32.partialorder %v1402_v1, 0.0  ;;  %906 = vrsqrt.f32 %v1494_v34  ;;  %v382_v15 = vsel %vm380_vm13, %v381_v11, %v379_v9 }
  0x6d   : > { %v400_v59 = vmul.f32 %v903_v41, %v399_v63  ;;  %vm402_vm0 = vcmp.eq.f32.partialorder %v1423_v36, inf  ;;  %v408_v60 = vmul.f32 %v905_v56, %v1458_v5  ;;  %v633_v13 = vsub.f32 0.0, %v382_v15  ;;  %v1549_v41 = vld [vmem:[%s1137_s24 + $0xb8] sm:$0xff] }
  0x6e   : > { %v391_v37 = vsel %vm390_vm14, %v1402_v1, %v389_v58  ;;  %v405_v62 = vand.u32 2147483648, %v1423_v36  ;;  %908 = vrsqrt.f32 %v1500_v7  ;;  %vm404_vm1 = vcmp.eq.f32.partialorder %v1423_v36, 0.0 }
  0x6f   : > { %v394_v14 = vsel %vm392_vm15, %v393_v6, %v391_v37  ;;  %v401_v33 = vmul.f32 %v400_v59, %v1423_v36  ;;  %v409_v16 = vmul.f32 %v905_v56, %v408_v60  ;;  %v665_v20 = vsel %vm601_vm10, %v633_v13, %v382_v15 }
  0x70   : > { %v634_v21 = vsub.f32 0.0, %v394_v14  ;;  %697 = vst [vmem:[%s1280_s17 + $0x70] sm:$0xff] %v665_v20  ;;  %v1531_v43 = vand.u32 2147483647, %v1519_v55  ;;  %vm603_vm2 = vcmp.lt.f32.partialorder %v1411_v49, 0.0  ;;  %vm414_vm3 = vcmp.eq.f32.partialorder %v1458_v5, inf }
  0x71   : > { %v403_v1 = vsel %vm402_vm0, %v1423_v36, %v401_v33  ;;  %v410_v23 = vmul.f32 0.5, %v409_v16  ;;  %v1537_v39 = vand.u32 2147483647, %v1524_v18  ;;  %vm416_vm4 = vcmp.eq.f32.partialorder %v1458_v5, 0.0  ;;  %v1607_v16 = vld [vmem:[%s1137_s24 + $0xc8] sm:$0xff] }
  0x72   : > { %v907_v24 = vpop.eup %906  ;;  %v666_v26 = vsel %vm602_vm12, %v634_v21, %v394_v14  ;;  %v406_v35 = vsel %vm404_vm1, %v405_v62, %v403_v1  ;;  %910 = vrsqrt.f32 %v1531_v43  ;;  %v417_v4 = vand.u32 2147483648, %v1458_v5 }
  0x73   : > { %698 = vst [vmem:[%s1280_s17 + $0x78] sm:$0xff] %v666_v26  ;;  %v635_v3 = vsub.f32 0.0, %v406_v35  ;;  %v411_v36 = vsub.f32 1.5, %v410_v23  ;;  %v420_v19 = vmul.f32 %v907_v24, %v1494_v34  ;;  %912 = vrsqrt.f32 %v1537_v39 }
  0x74   : > { %v909_v28 = vpop.eup %908  ;;  %vm604_vm5 = vcmp.lt.f32.partialorder %v1448_v30, 0.0  ;;  %vm426_vm6 = vcmp.eq.f32.partialorder %v1494_v34, inf  ;;  %v1558_v0 = vand.u32 2147483647, %v1545_v22  ;;  %vm428_vm7 = vcmp.eq.f32.partialorder %v1494_v34, 0.0 }
  0x75   : > { %v667_v49 = vsel %vm603_vm2, %v635_v3, %v406_v35  ;;  %v412_v8 = vmul.f32 %v905_v56, %v411_v36  ;;  %v421_v40 = vmul.f32 %v907_v24, %v420_v19  ;;  %v432_v42 = vmul.f32 %v909_v28, %v1500_v7 }
  0x76   : > { %699 = vst [vmem:[%s1280_s17 + $0x80] sm:$0xff] %v667_v49  ;;  %v429_v54 = vand.u32 2147483648, %v1494_v34  ;;  %vm605_vm8 = vcmp.lt.f32.partialorder %v1479_v27, 0.0  ;;  %vm438_vm9 = vcmp.eq.f32.partialorder %v1500_v7, inf  ;;  %v1568_v38 = vand.u32 2147483647, %v1549_v41 }
  0x77   : > { %v413_v17 = vmul.f32 %v412_v8, %v1458_v5  ;;  %v422_v45 = vmul.f32 0.5, %v421_v40  ;;  %v433_v61 = vmul.f32 %v909_v28, %v432_v42  ;;  %914 = vrsqrt.f32 %v1558_v0 }
  0x78   : > { %v911_v46 = vpop.eup %910  ;;  %vm440_vm10 = vcmp.eq.f32.partialorder %v1500_v7, 0.0  ;;  %v1579_v31 = vand.u32 2147483647, %v1561_v25  ;;  %v441_v52 = vand.u32 2147483648, %v1500_v7  ;;  %vm606_vm11 = vcmp.lt.f32.partialorder %v1485_v44, 0.0 }
  0x79   : > { %v415_v47 = vsel %vm414_vm3, %v1458_v5, %v413_v17  ;;  %v423_v57 = vsub.f32 1.5, %v422_v45  ;;  %v434_v48 = vmul.f32 0.5, %v433_v61  ;;  %v913_v2 = vpop.eup %912  ;;  %v444_v10 = vmul.f32 %v911_v46, %v1531_v43 }
  0x7a   : > { %v418_v29 = vsel %vm416_vm4, %v417_v4, %v415_v47  ;;  %v456_v32 = vmul.f32 %v913_v2, %v1537_v39  ;;  %916 = vrsqrt.f32 %v1568_v38  ;;  %vm450_vm12 = vcmp.eq.f32.partialorder %v1531_v43, inf }
  0x7b   : > { %v636_v50 = vsub.f32 0.0, %v418_v29  ;;  %v424_v51 = vmul.f32 %v907_v24, %v423_v57  ;;  %v435_v11 = vsub.f32 1.5, %v434_v48  ;;  %v445_v53 = vmul.f32 %v911_v46, %v444_v10  ;;  %v1644_v48 = vld [vmem:[%s1137_s24 + $0xd8] sm:$0xff] }
  0x7c   : > { %v457_v63 = vmul.f32 %v913_v2, %v456_v32  ;;  %vm452_vm13 = vcmp.eq.f32.partialorder %v1531_v43, 0.0  ;;  %918 = vrsqrt.f32 %v1579_v31  ;;  %v453_v15 = vand.u32 2147483648, %v1531_v43 }
  0x7d   : > { %v668_v5 = vsel %vm604_vm5, %v636_v50, %v418_v29  ;;  %v425_v12 = vmul.f32 %v424_v51, %v1494_v34  ;;  %v436_v6 = vmul.f32 %v909_v28, %v435_v11  ;;  %v446_v56 = vmul.f32 0.5, %v445_v53  ;;  %v915_v9 = vpop.eup %914 }
  0x7e   : > { %700 = vst [vmem:[%s1280_s17 + $0x88] sm:$0xff] %v668_v5  ;;  %vm607_vm14 = vcmp.lt.f32.partialorder %v1519_v55, 0.0  ;;  %v458_v59 = vmul.f32 0.5, %v457_v63  ;;  %vm462_vm15 = vcmp.eq.f32.partialorder %v1537_v39, inf  ;;  %v468_v37 = vmul.f32 %v915_v9, %v1558_v0 }
  0x7f   : > { %v427_v58 = vsel %vm426_vm6, %v1494_v34, %v425_v12  ;;  %v437_v30 = vmul.f32 %v436_v6, %v1500_v7  ;;  %v447_v13 = vsub.f32 1.5, %v446_v56  ;;  %vm464_vm0 = vcmp.eq.f32.partialorder %v1537_v39, 0.0 }
  0x80   : > { %v430_v60 = vsel %vm428_vm7, %v429_v54, %v427_v58  ;;  %v459_v33 = vsub.f32 1.5, %v458_v59  ;;  %v917_v20 = vpop.eup %916  ;;  %v465_v1 = vand.u32 2147483648, %v1537_v39  ;;  %v469_v23 = vmul.f32 %v915_v9, %v468_v37  ;;  %v1638_v54 = vld [vmem:[%s1137_s24 + $0xd0] sm:$0xff] }
  0x81   : > { %v637_v62 = vsub.f32 0.0, %v430_v60  ;;  %v439_v14 = vsel %vm438_vm9, %v1500_v7, %v437_v30  ;;  %v448_v21 = vmul.f32 %v911_v46, %v447_v13  ;;  %v480_v3 = vmul.f32 %v917_v20, %v1568_v38  ;;  %v1675_v30 = vld [vmem:[%s1137_s24 + $0xe0] sm:$0xff] }
  0x82   : > { %v442_v34 = vsel %vm440_vm10, %v441_v52, %v439_v14  ;;  %v460_v35 = vmul.f32 %v913_v2, %v459_v33  ;;  %v919_v36 = vpop.eup %918  ;;  %vm608_vm1 = vcmp.lt.f32.partialorder %v1524_v18, 0.0  ;;  %v470_v7 = vmul.f32 0.5, %v469_v23 }
  0x83   : > { %v669_v24 = vsel %vm605_vm8, %v637_v62, %v430_v60  ;;  %v638_v26 = vsub.f32 0.0, %v442_v34  ;;  %v449_v19 = vmul.f32 %v448_v21, %v1531_v43  ;;  %v1619_v28 = vand.u32 2147483647, %v1607_v16  ;;  %v1683_v60 = vld [vmem:[%s1137_s24 + $0xe8] sm:$0xff] }
  0x84   : > { %701 = vst [vmem:[%s1280_s17 + $0x90] sm:$0xff] %v669_v24  ;;  %v461_v49 = vmul.f32 %v460_v35, %v1537_v39  ;;  %vm609_vm2 = vcmp.lt.f32.partialorder %v1545_v22, 0.0  ;;  %v481_v8 = vmul.f32 %v917_v20, %v480_v3  ;;  %v492_v40 = vmul.f32 %v919_v36, %v1579_v31 }
  0x85   : > { %v670_v27 = vsel %vm606_vm11, %v638_v26, %v442_v34  ;;  %v451_v42 = vsel %vm450_vm12, %v1531_v43, %v449_v19  ;;  %v471_v4 = vsub.f32 1.5, %v470_v7  ;;  %vm474_vm3 = vcmp.eq.f32.partialorder %v1558_v0, inf }
  0x86   : > { %702 = vst [vmem:[%s1280_s17 + $0x98] sm:$0xff] %v670_v27  ;;  %920 = vrsqrt.f32 %v1619_v28  ;;  %v454_v44 = vsel %vm452_vm13, %v453_v15, %v451_v42  ;;  %v463_v17 = vsel %vm462_vm15, %v1537_v39, %v461_v49  ;;  %v482_v45 = vmul.f32 0.5, %v481_v8 }
  0x87   : > { %v493_v61 = vmul.f32 %v919_v36, %v492_v40  ;;  %v639_v46 = vsub.f32 0.0, %v454_v44  ;;  %v466_v47 = vsel %vm464_vm0, %v465_v1, %v463_v17  ;;  %v472_v57 = vmul.f32 %v915_v9, %v471_v4 }
  0x88   : > { %vm476_vm4 = vcmp.eq.f32.partialorder %v1558_v0, 0.0  ;;  %v640_v43 = vsub.f32 0.0, %v466_v47  ;;  %v477_v2 = vand.u32 2147483648, %v1558_v0  ;;  %v483_v29 = vsub.f32 1.5, %v482_v45 }
  0x89   : > { %v494_v10 = vmul.f32 0.5, %v493_v61  ;;  %v671_v50 = vsel %vm607_vm14, %v639_v46, %v454_v44  ;;  %v473_v51 = vmul.f32 %v472_v57, %v1558_v0  ;;  %vm486_vm5 = vcmp.eq.f32.partialorder %v1568_v38, inf }
  0x8a   : > { %v1652_v39 = vand.u32 2147483647, %v1638_v54  ;;  %703 = vst [vmem:[%s1280_s17 + $0xa0] sm:$0xff] %v671_v50  ;;  %v672_v11 = vsel %vm608_vm1, %v640_v43, %v466_v47  ;;  %v484_v32 = vmul.f32 %v917_v20, %v483_v29  ;;  %v1658_v53 = vand.u32 2147483647, %v1644_v48 }
  0x8b   : > { %v495_v52 = vsub.f32 1.5, %v494_v10  ;;  %704 = vst [vmem:[%s1280_s17 + $0xa8] sm:$0xff] %v672_v11  ;;  %v475_v55 = vsel %vm474_vm3, %v1558_v0, %v473_v51  ;;  %vm488_vm6 = vcmp.eq.f32.partialorder %v1568_v38, 0.0  ;;  %v489_v12 = vand.u32 2147483648, %v1568_v38 }
  0x8c   : > { %v921_v5 = vpop.eup %920  ;;  %922 = vrsqrt.f32 %v1652_v39  ;;  %v478_v18 = vsel %vm476_vm4, %v477_v2, %v475_v55  ;;  %v485_v6 = vmul.f32 %v484_v32, %v1568_v38  ;;  %vm498_vm7 = vcmp.eq.f32.partialorder %v1579_v31, inf }
  0x8d   : > { %v496_v63 = vmul.f32 %v919_v36, %v495_v52  ;;  %v504_v56 = vmul.f32 %v921_v5, %v1619_v28  ;;  %v641_v9 = vsub.f32 0.0, %v478_v18  ;;  %v501_v58 = vand.u32 2147483648, %v1579_v31 }
  0x8e   : > { %924 = vrsqrt.f32 %v1658_v53  ;;  %v487_v0 = vsel %vm486_vm5, %v1568_v38, %v485_v6  ;;  %vm500_vm8 = vcmp.eq.f32.partialorder %v1579_v31, 0.0  ;;  %vm610_vm9 = vcmp.lt.f32.partialorder %v1549_v41, 0.0 }
  0x8f   : > { %v497_v15 = vmul.f32 %v496_v63, %v1579_v31  ;;  %v505_v59 = vmul.f32 %v921_v5, %v504_v56  ;;  %v673_v13 = vsel %vm609_vm2, %v641_v9, %v478_v18  ;;  %v490_v37 = vsel %vm488_vm6, %v489_v12, %v487_v0 }
  0x90   : > { %705 = vst [vmem:[%s1280_s17 + $0xb0] sm:$0xff] %v673_v13  ;;  %v642_v62 = vsub.f32 0.0, %v490_v37  ;;  %v1693_v20 = vand.u32 2147483647, %v1675_v30  ;;  %vm611_vm10 = vcmp.lt.f32.partialorder %v1561_v25, 0.0  ;;  %v1707_v25 = vld [vmem:[%s1137_s24 + $0xf8] sm:$0xff] }
  0x91   : > { %v499_v14 = vsel %vm498_vm7, %v1579_v31, %v497_v15  ;;  %v506_v33 = vmul.f32 0.5, %v505_v59  ;;  %v1697_v22 = vand.u32 2147483647, %v1683_v60  ;;  %v1703_v31 = vld [vmem:[%s1137_s24 + $0xf0] sm:$0xff]  ;;  %vm510_vm11 = vcmp.eq.f32.partialorder %v1619_v28, inf }
  0x92   : > { %v923_v34 = vpop.eup %922  ;;  %v502_v21 = vsel %vm500_vm8, %v501_v58, %v499_v14  ;;  %v674_v38 = vsel %vm610_vm9, %v642_v62, %v490_v37  ;;  %926 = vrsqrt.f32 %v1693_v20  ;;  %vm512_vm12 = vcmp.eq.f32.partialorder %v1619_v28, 0.0 }
  0x93   : > { %v643_v41 = vsub.f32 0.0, %v502_v21  ;;  %v507_v1 = vsub.f32 1.5, %v506_v33  ;;  %v516_v23 = vmul.f32 %v923_v34, %v1652_v39  ;;  %706 = vst [vmem:[%s1280_s17 + $0xb8] sm:$0xff] %v674_v38  ;;  %v513_v19 = vand.u32 2147483648, %v1619_v28 }
  0x94   : > { %v925_v24 = vpop.eup %924  ;;  %928 = vrsqrt.f32 %v1697_v22  ;;  %v1716_v8 = vand.u32 2147483647, %v1703_v31  ;;  %v1719_v40 = vand.u32 2147483647, %v1707_v25  ;;  %vm612_vm13 = vcmp.lt.f32.partialorder %v1607_v16, 0.0 }
  0x95   : > { %v675_v26 = vsel %vm611_vm10, %v643_v41, %v502_v21  ;;  %v508_v35 = vmul.f32 %v921_v5, %v507_v1  ;;  %v517_v3 = vmul.f32 %v923_v34, %v516_v23  ;;  %v528_v36 = vmul.f32 %v925_v24, %v1658_v53 }
  0x96   : > { %707 = vst [vmem:[%s1280_s17 + $0xc0] sm:$0xff] %v675_v26  ;;  %930 = vrsqrt.f32 %v1716_v8  ;;  %vm522_vm14 = vcmp.eq.f32.partialorder %v1652_v39, inf  ;;  %vm524_vm15 = vcmp.eq.f32.partialorder %v1652_v39, 0.0  ;;  %vm534_vm0 = vcmp.eq.f32.partialorder %v1658_v53, inf }
  0x97   : > { %v509_v7 = vmul.f32 %v508_v35, %v1619_v28  ;;  %v518_v27 = vmul.f32 0.5, %v517_v3  ;;  %v529_v49 = vmul.f32 %v925_v24, %v528_v36  ;;  %932 = vrsqrt.f32 %v1719_v40 }
  0x98   : > { %v927_v17 = vpop.eup %926  ;;  %v537_v16 = vand.u32 2147483648, %v1658_v53  ;;  %vm536_vm1 = vcmp.eq.f32.partialorder %v1658_v53, 0.0  ;;  %vm613_vm2 = vcmp.lt.f32.partialorder %v1638_v54, 0.0  ;;  %vm614_vm3 = vcmp.lt.f32.partialorder %v1644_v48, 0.0 }
  0x99   : > { %v511_v42 = vsel %vm510_vm11, %v1619_v28, %v509_v7  ;;  %v519_v4 = vsub.f32 1.5, %v518_v27  ;;  %v530_v44 = vmul.f32 0.5, %v529_v49  ;;  %v540_v57 = vmul.f32 %v927_v17, %v1693_v20 }
  0x9a   : > { %v514_v45 = vsel %vm512_vm12, %v513_v19, %v511_v42  ;;  %v929_v43 = vpop.eup %928  ;;  %v525_v28 = vand.u32 2147483648, %v1652_v39  ;;  %vm546_vm4 = vcmp.eq.f32.partialorder %v1693_v20, inf  ;;  %v549_v54 = vand.u32 2147483648, %v1693_v20 }
  0x9b   : > { %v644_v61 = vsub.f32 0.0, %v514_v45  ;;  %v520_v46 = vmul.f32 %v923_v34, %v519_v4  ;;  %v531_v47 = vsub.f32 1.5, %v530_v44  ;;  %v541_v50 = vmul.f32 %v927_v17, %v540_v57 }
  0x9c   : > { %v552_v51 = vmul.f32 %v929_v43, %v1697_v22  ;;  %v931_v11 = vpop.eup %930  ;;  %vm548_vm5 = vcmp.eq.f32.partialorder %v1693_v20, 0.0  ;;  %vm615_vm6 = vcmp.lt.f32.partialorder %v1675_v30, 0.0  ;;  %vm558_vm7 = vcmp.eq.f32.partialorder %v1697_v22, inf }
  0x9d   : > { %v676_v2 = vsel %vm612_vm13, %v644_v61, %v514_v45  ;;  %v521_v29 = vmul.f32 %v520_v46, %v1652_v39  ;;  %v532_v10 = vmul.f32 %v925_v24, %v531_v47  ;;  %v542_v5 = vmul.f32 0.5, %v541_v50  ;;  %v933_v9 = vpop.eup %932 }
  0x9e   : > { %708 = vst [vmem:[%s1280_s17 + $0xc8] sm:$0xff] %v676_v2  ;;  %v553_v12 = vmul.f32 %v929_v43, %v552_v51  ;;  %v564_v18 = vmul.f32 %v931_v11, %v1716_v8  ;;  %v576_v37 = vmul.f32 %v933_v9, %v1719_v40  ;;  %v561_v41 = vand.u32 2147483648, %v1697_v22 }
  0x9f   : > { %v523_v32 = vsel %vm522_vm14, %v1652_v39, %v521_v29  ;;  %v533_v52 = vmul.f32 %v532_v10, %v1658_v53  ;;  %v543_v56 = vsub.f32 1.5, %v542_v5  ;;  %vm560_vm8 = vcmp.eq.f32.partialorder %v1697_v22, 0.0 }
  0xa0   : > { %v526_v55 = vsel %vm524_vm15, %v525_v28, %v523_v32  ;;  %v554_v0 = vmul.f32 0.5, %v553_v12  ;;  %v565_v15 = vmul.f32 %v931_v11, %v564_v18  ;;  %v577_v48 = vmul.f32 %v933_v9, %v576_v37 }
  0xa1   : > { %v645_v6 = vsub.f32 0.0, %v526_v55  ;;  %v535_v63 = vsel %vm534_vm0, %v1658_v53, %v533_v52  ;;  %v544_v13 = vmul.f32 %v927_v17, %v543_v56  ;;  %vm570_vm9 = vcmp.eq.f32.partialorder %v1716_v8, inf }
  0xa2   : > { %v538_v58 = vsel %vm536_vm1, %v537_v16, %v535_v63  ;;  %v555_v62 = vsub.f32 1.5, %v554_v0  ;;  %v566_v53 = vmul.f32 0.5, %v565_v15  ;;  %v578_v1 = vmul.f32 0.5, %v577_v48 }
  0xa3   : > { %v677_v59 = vsel %vm613_vm2, %v645_v6, %v526_v55  ;;  %v646_v39 = vsub.f32 0.0, %v538_v58  ;;  %v545_v33 = vmul.f32 %v544_v13, %v1693_v20  ;;  %v573_v3 = vand.u32 2147483648, %v1716_v8 }
  0xa4   : > { %709 = vst [vmem:[%s1280_s17 + $0xd0] sm:$0xff] %v677_v59  ;;  %v556_v34 = vmul.f32 %v929_v43, %v555_v62  ;;  %v567_v21 = vsub.f32 1.5, %v566_v53  ;;  %v579_v36 = vsub.f32 1.5, %v578_v1  ;;  %vm572_vm10 = vcmp.eq.f32.partialorder %v1716_v8, 0.0 }
  0xa5   : > { %v678_v14 = vsel %vm614_vm3, %v646_v39, %v538_v58  ;;  %v547_v38 = vsel %vm546_vm4, %v1693_v20, %v545_v33  ;;  %vm616_vm11 = vcmp.lt.f32.partialorder %v1683_v60, 0.0  ;;  %vm582_vm12 = vcmp.eq.f32.partialorder %v1719_v40, inf }
  0xa6   : > { %710 = vst [vmem:[%s1280_s17 + $0xd8] sm:$0xff] %v678_v14  ;;  %v550_v23 = vsel %vm548_vm5, %v549_v54, %v547_v38  ;;  %v557_v24 = vmul.f32 %v556_v34, %v1697_v22  ;;  %v568_v26 = vmul.f32 %v931_v11, %v567_v21  ;;  %v580_v49 = vmul.f32 %v933_v9, %v579_v36 }
  0xa7   : > { %v647_v35 = vsub.f32 0.0, %v550_v23  ;;  %v585_v30 = vand.u32 2147483648, %v1719_v40  ;;  %vm617_vm13 = vcmp.lt.f32.partialorder %v1703_v31, 0.0  ;;  %vm584_vm14 = vcmp.eq.f32.partialorder %v1719_v40, 0.0 }
  0xa8   : > { %v559_v20 = vsel %vm558_vm7, %v1697_v22, %v557_v24  ;;  %v569_v19 = vmul.f32 %v568_v26, %v1716_v8  ;;  %v581_v60 = vmul.f32 %v580_v49, %v1719_v40  ;;  %vm618_vm15 = vcmp.lt.f32.partialorder %v1707_v25, 0.0 }
  0xa9   : > { %v679_v7 = vsel %vm615_vm6, %v647_v35, %v550_v23  ;;  %v562_v27 = vsel %vm560_vm8, %v561_v41, %v559_v20 }
  0xaa   : > { %711 = vst [vmem:[%s1280_s17 + $0xe0] sm:$0xff] %v679_v7  ;;  %v648_v42 = vsub.f32 0.0, %v562_v27  ;;  %v571_v22 = vsel %vm570_vm9, %v1716_v8, %v569_v19  ;;  %v583_v8 = vsel %vm582_vm12, %v1719_v40, %v581_v60 }
  0xab   : > { %v574_v4 = vsel %vm572_vm10, %v573_v3, %v571_v22  ;;  %v586_v61 = vsel %vm584_vm14, %v585_v30, %v583_v8 }
  0xac   : > { %v680_v44 = vsel %vm616_vm11, %v648_v42, %v562_v27  ;;  %v649_v17 = vsub.f32 0.0, %v574_v4  ;;  %v650_v31 = vsub.f32 0.0, %v586_v61 }
  0xad   : > { %712 = vst [vmem:[%s1280_s17 + $0xe8] sm:$0xff] %v680_v44 }
  0xae   : > { %v681_v45 = vsel %vm617_vm13, %v649_v17, %v574_v4  ;;  %v682_v46 = vsel %vm618_vm15, %v650_v31, %v586_v61 }
  0xaf   : > { %713 = vst [vmem:[%s1280_s17 + $0xf0] sm:$0xff] %v681_v45 }
  0xb0   : > { %714 = vst [vmem:[%s1280_s17 + $0xf8] sm:$0xff] %v682_v46 }
  0xb1   : > { %991 = shalt.err (!%p988_p4)
}
  0xb2   : > { %s1034_s16 = smov 128   ;;  %s1035_s20 = smov 8  }
  0xb3   : > { %822 = dma.vmem_to_hbm [thread:$0]  (%p1095_p10), %s729_s28, 4096, %s731_s29, %s716_s30, %s1034_s16, %s1034_s16, %s1035_s20  }
  0xb4 PF: > { %p833_p5 = scmp.ge.s32.totalorder %s1030_s9, 2  ;;  %s745_s21 = sand.u32 1, %s1018_s6  }
  0xb5   : > { %s746_s22 = scalar_lea.sflag [#allocation4], %s745_s21 }
  0xb6   : > { %p829_p7 = pnand %p833_p5, %p1099_p11 }
  0xb8   : > { %p830_p8 = pneg %p829_p7 }
  0xba   : > { %1013 = dma.done.wait (%p830_p8), %s746_s22, 4096  }
  0xbb   : > { %1015 = vsyncadd (%p830_p8), %s746_s22, 4294963200  ;;  %p14_p9 = scmp.ge.s32.totalorder %s1071_s12, 10   ;;  %s1820_s6 = smov %s1022_s7 }
  0xbc   : > { %s1821_s7 = smov %s1026_s8  ;;  %s1822_s8 = smov %s1083_s15 }
  0xbd   : > { %s1823_s9 = smov %s1071_s12  ;;  %16 = sbr.rel (!%p14_p9) target bundleno = 5 (0x5), region = 69 }
  0xc2   :  { %752 = vsyncpa [#allocation3], 1 }
  0xc3   :  { %754 = vsyncpa [#allocation3 + $0x1], 1 }
  0xc4   :  { %755 = vsyncpa [#allocation4], 1 }
  0xc5   :  { %757 = vsyncpa [#allocation4 + $0x1], 1 }

</bundles_post_ra>
